<compile_context>
chip_gen: v6e
topology: v6e:2x2x1
jax: 0.10.0
libtpu: 0.0.40
codegen_flags: <defaults>
</compile_context>

<pallas_src>
import jax
import jax.numpy as jnp
import numpy as np
from jax import lax
from jax.experimental import pallas as pl
from jax.experimental.pallas import tpu as pltpu

NUM_CLASSES = 3
FLATTENED_SIZE = 1000
CIN = 4
CFEAT = 32
N_PAD = 128   # classifier lane padding (3 -> 128) for dense, unmasked stores
M_PAD = 8     # sublane padding of the head matmul / output rows


# ---------------------------------------------------------------------------
# Fused Pallas kernel: one grid step == one batch element
# ---------------------------------------------------------------------------
def _fused_kernel(patches_ref, conv_w_ref, conv_b_ref, head_w_ref, head_b_ref, o_ref):
    """
    patches_ref : (HW, 9*Cin)     im2col rows of this image
    conv_w_ref  : (9*Cin, Cfeat)
    conv_b_ref  : (1, Cfeat)
    head_w_ref  : (Cfeat, N_PAD)  folded fc@cls weight, zero-padded to 128 lanes
    head_b_ref  : (1, N_PAD)
    o_ref       : (M_PAD, N_PAD)  logits broadcast over 8 sublanes; row 0 is the result
    """
    # Conv2d(3x3, pad=1) as a GEMM (MXU) + bias + ReLU (VPU)
    act = jnp.dot(patches_ref[...], conv_w_ref[...], preferred_element_type=jnp.float32)
    act = jnp.maximum(act + conv_b_ref[...], 0.0)                   # (HW, Cfeat)

    # AdaptiveAvgPool2d(1) + flatten: mean over the spatial rows, kept in VMEM
    pooled = jnp.mean(act, axis=0, keepdims=True)                   # (1, Cfeat)
    pooled = jnp.broadcast_to(pooled, (M_PAD, pooled.shape[1]))     # pad M to a full sublane tile

    # Linear(32->1000) -> Dropout(p=0.0) -> Linear(1000->3), algebraically folded to 32 -> N_PAD
    logits = jnp.dot(pooled, head_w_ref[...], preferred_element_type=jnp.float32) + head_b_ref[...]
    o_ref[...] = logits.astype(o_ref.dtype)                         # dense (8, 128) store


# ---------------------------------------------------------------------------
# Glue: im2col (XLA) + the single pallas_call
# ---------------------------------------------------------------------------
def _im2col_3x3(x_nchw):
    """NCHW -> per-batch im2col patch matrix (B, H*W, 9*Cin), padding=1, stride=1."""
    B, cin, H, W = x_nchw.shape
    x = jnp.transpose(x_nchw, (0, 2, 3, 1))                          # NHWC
    xp = jnp.pad(x, ((0, 0), (1, 1), (1, 1), (0, 0)))
    patches = jnp.stack(
        [xp[:, dy:dy + H, dx:dx + W, :] for dy in range(3) for dx in range(3)], axis=3
    )                                                                # (B, H, W, 9, Cin)
    return patches.reshape(B, H * W, 9 * cin)


def drac_forward_pallas(x_nchw, fused_params):
    B, cin, H, W = x_nchw.shape
    HW = H * W
    KC = 9 * cin
    patches = _im2col_3x3(x_nchw)                                    # (B, HW, KC)

    flops = 2 * B * HW * KC * CFEAT + 2 * B * M_PAD * CFEAT * N_PAD
    bytes_accessed = 4 * (B * HW * KC + KC * CFEAT + CFEAT
                          + CFEAT * N_PAD + N_PAD + B * M_PAD * N_PAD)

    out = pl.pallas_call(
        _fused_kernel,
        grid=(B,),
        in_specs=[
            pl.BlockSpec((None, HW, KC), lambda b: (b, 0, 0)),       # this batch's patch rows
            pl.BlockSpec((KC, CFEAT), lambda b: (0, 0)),
            pl.BlockSpec((1, CFEAT), lambda b: (0, 0)),
            pl.BlockSpec((CFEAT, N_PAD), lambda b: (0, 0)),
            pl.BlockSpec((1, N_PAD), lambda b: (0, 0)),
        ],
        out_specs=pl.BlockSpec((None, M_PAD, N_PAD), lambda b: (b, 0, 0)),
        out_shape=jax.ShapeDtypeStruct((B, M_PAD, N_PAD), jnp.float32),
        compiler_params=pltpu.CompilerParams(dimension_semantics=("parallel",)),
        cost_estimate=pl.CostEstimate(flops=flops, transcendentals=0,
                                      bytes_accessed=bytes_accessed),
    )(patches,
      fused_params["conv_w"], fused_params["conv_b"],
      fused_params["head_w"], fused_params["head_b"])
    return out[:, 0, :NUM_CLASSES]


drac_forward = jax.jit(drac_forward_pallas)


# ---------------------------------------------------------------------------
# Parameters (original per-layer params) + host-side algebraic fold
# ---------------------------------------------------------------------------
def init_params(key, *, cin=CIN, cfeat=CFEAT, flattened_size=FLATTENED_SIZE,
                num_classes=NUM_CLASSES):
    ks = jax.random.split(key, 6)
    conv_w = (jax.random.normal(ks[0], (3, 3, cin, cfeat), jnp.float32)
              * (1.0 / np.sqrt(9 * cin))).reshape(9 * cin, cfeat)
    conv_b = jnp.zeros((cfeat,), jnp.float32)
    fc_w = jax.random.normal(ks[1], (cfeat, flattened_size), jnp.float32) * (1.0 / np.sqrt(cfeat))
    fc_b = jax.random.normal(ks[2], (flattened_size,), jnp.float32) * 0.01
    # classifier Linear: kaiming_normal_ (fan_in = flattened_size, gain = sqrt(2))
    cls_w = jax.random.normal(ks[3], (flattened_size, num_classes), jnp.float32) * np.sqrt(
        2.0 / flattened_size)
    bound = 1.0 / np.sqrt(flattened_size)
    cls_b = jax.random.uniform(ks[4], (num_classes,), jnp.float32, minval=-bound, maxval=bound)
    return dict(conv_w=conv_w, conv_b=conv_b, fc_w=fc_w, fc_b=fc_b, cls_w=cls_w, cls_b=cls_b)


def fold_params(params):
    """Fold Linear(32->1000) -> Dropout(p=0.0) -> Linear(1000->3) into one affine map (exact),
    then zero-pad the output dim to N_PAD lanes.  Done once on the host, outside the hot path."""
    hi = lax.Precision.HIGHEST
    w = jnp.dot(params["fc_w"], params["cls_w"], precision=hi)                       # (Cfeat, 3)
    b = jnp.dot(params["fc_b"], params["cls_w"], precision=hi) + params["cls_b"]     # (3,)
    head_w = jnp.zeros((params["fc_w"].shape[0], N_PAD), jnp.float32).at[:, :NUM_CLASSES].set(w)
    head_b = jnp.zeros((1, N_PAD), jnp.float32).at[0, :NUM_CLASSES].set(b)
    return dict(conv_w=params["conv_w"],
                conv_b=params["conv_b"].reshape(1, CFEAT),
                head_w=head_w, head_b=head_b)


# ---------------------------------------------------------------------------
# References
# ---------------------------------------------------------------------------
def drac_forward_ref_folded(x_nchw, fused_params):
    """Pure-JAX reference with the SAME fused structure as the kernel (tight tolerance check)."""
    B, cin, H, W = x_nchw.shape
    patches = _im2col_3x3(x_nchw)
    act = jnp.einsum("bpk,kc->bpc", patches, fused_params["conv_w"])
    act = jnp.maximum(act + fused_params["conv_b"][0], 0.0)
    pooled = jnp.mean(act, axis=1)
    return (pooled @ fused_params["head_w"] + fused_params["head_b"][0])[:, :NUM_CLASSES]


def drac_forward_ref_unfused_f64(x_nchw, params):
    """float64 NumPy reference of the ORIGINAL (unfolded) module chain: backbone -> Dropout(0.0)
    -> Linear(1000,3).  Validates that the algebraic fold preserves the module's semantics."""
    x = np.asarray(x_nchw, np.float64)
    B, cin, H, W = x.shape
    xn = np.transpose(x, (0, 2, 3, 1))
    xp = np.pad(xn, ((0, 0), (1, 1), (1, 1), (0, 0)))
    patches = np.stack(
        [xp[:, dy:dy + H, dx:dx + W, :] for dy in range(3) for dx in range(3)], axis=3
    ).reshape(B * H * W, 9 * cin)
    p = {k: np.asarray(v, np.float64) for k, v in params.items()}
    conv = np.maximum(patches @ p["conv_w"] + p["conv_b"], 0.0)
    pooled = conv.reshape(B, H * W, -1).mean(axis=1)                 # AdaptiveAvgPool2d + flatten
    feats = pooled @ p["fc_w"] + p["fc_b"]                           # backbone head Linear(32->1000)
    return feats @ p["cls_w"] + p["cls_b"]                           # Dropout(0.0) -> Linear(1000->3)


if __name__ == "__main__":
    key = jax.random.PRNGKey(0)
    k_x, k_p = jax.random.split(key)
    x = jax.random.normal(k_x, (2, CIN, 16, 16), jnp.float32)        # NCHW, like the PyTorch module
    params = init_params(k_p)
    fused = fold_params(params)

    out = jax.block_until_ready(drac_forward(x, fused))
    assert out.shape == (2, NUM_CLASSES), out.shape

    # (1) kernel check: structure-matched pure-JAX reference, tight tolerance.
    ref = np.asarray(drac_forward_ref_folded(x, fused))
    np.testing.assert_allclose(np.asarray(out), ref, rtol=1e-4, atol=1e-4)

    # (2) semantics check vs. the original unfolded fc -> dropout(0.0) -> classifier chain in
    #     float64; looser tolerance covers possible reduced-precision f32 MXU passes.
    ref64 = drac_forward_ref_unfused_f64(x, params)
    np.testing.assert_allclose(np.asarray(out), ref64.astype(np.float32), rtol=1e-2, atol=1e-2)

    print("KERNEL_OK")
</pallas_src>

<mosaic_0001>
module attributes {stable_mosaic.version = 11 : i64} {
  func.func @_fused_kernel(%arg0: i32, %arg1: memref<1x256x36xf32, #tpu.memory_space<vmem>>, %arg2: memref<36x32xf32, #tpu.memory_space<vmem>>, %arg3: memref<1x32xf32, #tpu.memory_space<vmem>>, %arg4: memref<32x128xf32, #tpu.memory_space<vmem>>, %arg5: memref<1x128xf32, #tpu.memory_space<vmem>>, %arg6: memref<1x8x128xf32, #tpu.memory_space<vmem>>) attributes {dimension_semantics = [#tpu.dimension_semantics<parallel>], iteration_bounds = array<i64: 2>, scalar_prefetch = 0 : i64, scratch_operands = 0 : i64, tpu.core_type = #tpu.core_type<tc>, window_params = [{transform_indices = @transform_0, window_bounds = array<i64: 1, 256, 36>}, {pipeline_mode = #tpu.pipeline_mode<synchronous>, transform_indices = @transform_1, window_bounds = array<i64: 36, 32>}, {pipeline_mode = #tpu.pipeline_mode<synchronous>, transform_indices = @transform_2, window_bounds = array<i64: 1, 32>}, {pipeline_mode = #tpu.pipeline_mode<synchronous>, transform_indices = @transform_3, window_bounds = array<i64: 32, 128>}, {pipeline_mode = #tpu.pipeline_mode<synchronous>, transform_indices = @transform_4, window_bounds = array<i64: 1, 128>}, {transform_indices = @transform_5, window_bounds = array<i64: 1, 8, 128>}]} {
    %c0 = arith.constant 0 : index
    %c0_0 = arith.constant 0 : index
    %c0_1 = arith.constant 0 : index
    %0 = vector.load %arg1[%c0, %c0_0, %c0_1] : memref<1x256x36xf32, #tpu.memory_space<vmem>>, vector<1x256x36xf32>
    %1 = vector.shape_cast %0 : vector<1x256x36xf32> to vector<256x36xf32>
    %c0_2 = arith.constant 0 : index
    %c0_3 = arith.constant 0 : index
    %2 = vector.load %arg2[%c0_2, %c0_3] : memref<36x32xf32, #tpu.memory_space<vmem>>, vector<36x32xf32>
    %cst = arith.constant dense<0.000000e+00> : vector<256x32xf32>
    %3 = tpu.matmul %1, %2, %cst {dimension_numbers = #tpu.dot_dimension_numbers<[1], [0], [0], [1], [0, 0, 1, 1], [], []>} : vector<256x36xf32>, vector<36x32xf32>, vector<256x32xf32> -> vector<256x32xf32>
    %c0_4 = arith.constant 0 : index
    %c0_5 = arith.constant 0 : index
    %4 = vector.load %arg3[%c0_4, %c0_5] : memref<1x32xf32, #tpu.memory_space<vmem>>, vector<1x32xf32>
    %5 = vector.broadcast %4 : vector<1x32xf32> to vector<256x32xf32>
    %6 = arith.addf %3, %5 : vector<256x32xf32>
    %cst_6 = arith.constant 0.000000e+00 : f32
    %7 = vector.broadcast %cst_6 : f32 to vector<256x32xf32>
    %8 = arith.maximumf %6, %7 : vector<256x32xf32>
    %cst_7 = arith.constant dense<0.000000e+00> : vector<32xf32>
    %9 = vector.multi_reduction <add>, %8, %cst_7 [0] : vector<256x32xf32> to vector<32xf32>
    %10 = vector.shape_cast %9 : vector<32xf32> to vector<1x32xf32>
    %cst_8 = arith.constant 2.560000e+02 : f32
    %11 = vector.broadcast %cst_8 : f32 to vector<1x32xf32>
    %12 = arith.divf %10, %11 : vector<1x32xf32>
    %13 = vector.shape_cast %12 : vector<1x32xf32> to vector<1x32xf32>
    %14 = vector.broadcast %13 : vector<1x32xf32> to vector<8x32xf32>
    %c0_9 = arith.constant 0 : index
    %c0_10 = arith.constant 0 : index
    %15 = vector.load %arg4[%c0_9, %c0_10] : memref<32x128xf32, #tpu.memory_space<vmem>>, vector<32x128xf32>
    %cst_11 = arith.constant dense<0.000000e+00> : vector<8x128xf32>
    %16 = tpu.matmul %14, %15, %cst_11 {dimension_numbers = #tpu.dot_dimension_numbers<[1], [0], [0], [1], [0, 0, 1, 1], [], []>} : vector<8x32xf32>, vector<32x128xf32>, vector<8x128xf32> -> vector<8x128xf32>
    %c0_12 = arith.constant 0 : index
    %c0_13 = arith.constant 0 : index
    %17 = vector.load %arg5[%c0_12, %c0_13] : memref<1x128xf32, #tpu.memory_space<vmem>>, vector<1x128xf32>
    %18 = vector.broadcast %17 : vector<1x128xf32> to vector<8x128xf32>
    %19 = arith.addf %16, %18 : vector<8x128xf32>
    %c0_14 = arith.constant 0 : index
    %c0_15 = arith.constant 0 : index
    %c0_16 = arith.constant 0 : index
    %20 = vector.load %arg6[%c0_14, %c0_15, %c0_16] : memref<1x8x128xf32, #tpu.memory_space<vmem>>, vector<1x8x128xf32>
    %21 = vector.shape_cast %20 : vector<1x8x128xf32> to vector<8x128xf32>
    %22 = vector.shape_cast %19 : vector<8x128xf32> to vector<1x8x128xf32>
    tpu.vector_store %arg6[%c0_14, %c0_15, %c0_16], %22 {strides = array<i32>} : memref<1x8x128xf32, #tpu.memory_space<vmem>>, vector<1x8x128xf32>,
    return
  }
  func.func @transform_0(%arg0: i32) -> (i32, i32, i32) {
    %c0_i32 = arith.constant 0 : i32
    %c0_i32_0 = arith.constant 0 : i32
    %c0_i32_1 = arith.constant 0 : i32
    return %arg0, %c0_i32, %c0_i32_0 : i32, i32, i32
  }
  func.func @transform_1(%arg0: i32) -> (i32, i32) {
    %c0_i32 = arith.constant 0 : i32
    %c0_i32_0 = arith.constant 0 : i32
    %c0_i32_1 = arith.constant 0 : i32
    return %c0_i32, %c0_i32_0 : i32, i32
  }
  func.func @transform_2(%arg0: i32) -> (i32, i32) {
    %c0_i32 = arith.constant 0 : i32
    %c0_i32_0 = arith.constant 0 : i32
    %c0_i32_1 = arith.constant 0 : i32
    return %c0_i32, %c0_i32_0 : i32, i32
  }
  func.func @transform_3(%arg0: i32) -> (i32, i32) {
    %c0_i32 = arith.constant 0 : i32
    %c0_i32_0 = arith.constant 0 : i32
    %c0_i32_1 = arith.constant 0 : i32
    return %c0_i32, %c0_i32_0 : i32, i32
  }
  func.func @transform_4(%arg0: i32) -> (i32, i32) {
    %c0_i32 = arith.constant 0 : i32
    %c0_i32_0 = arith.constant 0 : i32
    %c0_i32_1 = arith.constant 0 : i32
    return %c0_i32, %c0_i32_0 : i32, i32
  }
  func.func @transform_5(%arg0: i32) -> (i32, i32, i32) {
    %c0_i32 = arith.constant 0 : i32
    %c0_i32_0 = arith.constant 0 : i32
    %c0_i32_1 = arith.constant 0 : i32
    return %arg0, %c0_i32, %c0_i32_0 : i32, i32, i32
  }
}

</mosaic_0001>

<bundles_post_ra>
// kernel: drac_forward_pallas.1
= control target key start
LH: loop header
LB: loop body
LE: loop exit
PB: predicated region body
PF: predicated region fallthrough
CT: control target
= control target key end

     0   :  { %s1053_s18 = smov 0   ;;  %s1255_s0 = inlined_call_operand.vmem [shape: f32[2,256,36], index: 0, kind: input, shape index: {}]   ;;  %s1256_s1 = inlined_call_operand.vmem [shape: f32[36,32], index: 1, kind: input, shape index: {}]   ;;  %s1257_s2 = inlined_call_operand.vmem [shape: f32[1,32], index: 2, kind: input, shape index: {}]   ;;  %s1258_s3 = inlined_call_operand.vmem [shape: f32[32,128], index: 3, kind: input, shape index: {}]   ;;  %s1259_s4 = inlined_call_operand.vmem [shape: f32[1,128], index: 4, kind: input, shape index: {}]   ;;  %s1260_s5 = inlined_call_operand.vmem [shape: f32[2,8,128], index: 5, kind: output, shape index: {}]  }
   0x1 LB: > { %s835_s19 = sadd.s32 4294967295, %s1019_s18   ;;  %p839_p0 = scmp.ge.s32.totalorder %s1019_s18, 1  ;;  %s1019_s18 = sphi %s1053_s18, %s15_s18  }
   0x2   : > { %p187_p1 = scmp.lt.s32.totalorder %s1019_s18, 3 }
   0x4   : > { %p188_p2 = pnand %p839_p0, %p187_p1 }
   0x5   : > { %p214_p3 = scmp.lt.s32.totalorder (!%p188_p2), %s835_s19, 1 }
   0x6   : > { %191 = sbr.rel (%p188_p2) target bundleno = 496 (0x1f0), region = 40 }
   0xb   : > { %v259_v0 = vld [vmem:[%s1256_s1 + $0x20] sm:$0xf]  ;;  %vm364_vm0 = vcmask 1043456   ;;  %v258_v1 = vld [vmem:[%s1256_s1 + $0x18] sm:$0xff]  ;;  %v257_v2 = vld [vmem:[%s1256_s1 + $0x10] sm:$0xff]  ;;  %s1262_s19 = smov (!%p214_p3, %s835_s19), 1 }
   0xc   : > { %924 = vmatprep.subr.msk.mxu0 %vm364_vm0, %v259_v0  ;;  %993 = vmatprep.subr.msk.mxu1 %vm364_vm0, %v259_v0  ;;  %v256_v3 = vld [vmem:[%s1256_s1 + $0x8] sm:$0xff]  ;;  %s881_s28 = sshll.u32 %s1262_s19, 8  ;;  %vm267_vm1 = vcmask 293888   ;;  %v255_v4 = vld [vmem:[%s1256_s1] sm:$0xff]  ;;  %v700_v37 = vld [vmem:[%s1258_s3 + $0x18] sm:$0xff]  ;;  %v1021_v38 = vmov 0.0  }
   0xd   : > { %925 = vmatpush3.msk.msra.mxu0 %vm364_vm0, %v259_v0  ;;  %998 = vmatpush3.msk.msra.mxu1 %vm364_vm0, %v259_v0  ;;  %s1079_s6 = scalar_lea.vmem %s1255_s0, %s881_s28  ;;  %v699_v39 = vld [vmem:[%s1258_s3 + $0x10] sm:$0xff]  ;;  %v698_v40 = vld [vmem:[%s1258_s3 + $0x8] sm:$0xff]  ;;  %v697_v41 = vld [vmem:[%s1258_s3] sm:$0xff]  ;;  %vm1022_vm2 = vmmov 0   ;;  %vm625_vm3 = vcmask 261120   ;;  %s842_s21 = sshll.u32 %s1262_s19, 3 }
   0xe   : > { %926 = vmatprep.subr.mxu0 %v258_v1  ;;  %994 = vmatprep.subr.mxu1 %v258_v1  ;;  %v223_v5 = vld [vmem:[%s1079_s6] sm:$0xff]  ;;  %v224_v6 = vld [vmem:[%s1079_s6 + $0x8] sm:$0xff]  ;;  %v225_v7 = vld [vmem:[%s1079_s6 + $0x10] sm:$0xff]  ;;  %s222_s26 = scalar_lea.vmem %s1260_s5, %s842_s21 }
   0xf   : > { %927 = vmatpush3.msra.mxu0 %v258_v1  ;;  %999 = vmatpush3.msra.mxu1 %v258_v1  ;;  %v226_v8 = vld [vmem:[%s1079_s6 + $0x18] sm:$0xff]  ;;  %v241_v9 = vld [vmem:[%s1079_s6 + $0x90] sm:$0xff]  ;;  %v243_v11 = vld [vmem:[%s1079_s6 + $0xa0] sm:$0xff] }
  0x10   : > { %928 = vmatprep.subr.mxu0 %v257_v2  ;;  %995 = vmatprep.subr.mxu1 %v257_v2  ;;  %v242_v10 = vld [vmem:[%s1079_s6 + $0x98] sm:$0xff]  ;;  %v227_v12 = vld [vmem:[%s1079_s6 + $0x20] sm:$0xff]  ;;  %v244_v13 = vld [vmem:[%s1079_s6 + $0xa8] sm:$0xff] }
  0x11   : > { %929 = vmatpush3.msra.mxu0 %v257_v2  ;;  %1000 = vmatpush3.msra.mxu1 %v257_v2  ;;  %v228_v14 = vld [vmem:[%s1079_s6 + $0x28] sm:$0xff]  ;;  %v245_v15 = vld [vmem:[%s1079_s6 + $0xb0] sm:$0xff]  ;;  %v246_v17 = vld [vmem:[%s1079_s6 + $0xb8] sm:$0xff] }
  0x12   : > { %930 = vmatprep.subr.mxu0 %v256_v3  ;;  %934 = vmatprep.mubr.msk.f32.mxu0 %vm267_vm1, %v223_v5  ;;  %v229_v16 = vld [vmem:[%s1079_s6 + $0x30] sm:$0xff]  ;;  %v230_v18 = vld [vmem:[%s1079_s6 + $0x38] sm:$0xff]  ;;  %v247_v19 = vld [vmem:[%s1079_s6 + $0xc0] sm:$0xff] }
  0x13   : > { %931 = vmatpush3.msra.mxu0 %v256_v3  ;;  %996 = vmatprep.subr.mxu1 %v256_v3  ;;  %v231_v20 = vld [vmem:[%s1079_s6 + $0x40] sm:$0xff]  ;;  %v248_v21 = vld [vmem:[%s1079_s6 + $0xc8] sm:$0xff]  ;;  %v249_v23 = vld [vmem:[%s1079_s6 + $0xd0] sm:$0xff] }
  0x14   : > { %932 = vmatprep.subr.mxu0 %v255_v4  ;;  %1001 = vmatpush3.msra.mxu1 %v256_v3  ;;  %v232_v22 = vld [vmem:[%s1079_s6 + $0x48] sm:$0xff]  ;;  %v233_v24 = vld [vmem:[%s1079_s6 + $0x50] sm:$0xff]  ;;  %v250_v25 = vld [vmem:[%s1079_s6 + $0xd8] sm:$0xff] }
  0x15   : > { %933 = vmatpush3.msra.mxu0 %v255_v4  ;;  %997 = vmatprep.subr.mxu1 %v255_v4  ;;  %v234_v26 = vld [vmem:[%s1079_s6 + $0x58] sm:$0xff]  ;;  %v251_v27 = vld [vmem:[%s1079_s6 + $0xe0] sm:$0xff]  ;;  %v252_v29 = vld [vmem:[%s1079_s6 + $0xe8] sm:$0xff] }
  0x16   : > { %935 = vmatmul.mubr.msk.f32.vlgmr.msra.gmra.mxu0 %vm267_vm1, %v224_v6  ;;  %1002 = vmatpush3.msra.mxu1 %v255_v4  ;;  %v235_v28 = vld [vmem:[%s1079_s6 + $0x60] sm:$0xff]  ;;  %v236_v30 = vld [vmem:[%s1079_s6 + $0x68] sm:$0xff]  ;;  %v253_v31 = vld [vmem:[%s1079_s6 + $0xf0] sm:$0xff] }
  0x17   : > { %937 = vmatprep.mubr.msk.f32.mxu0 %vm267_vm1, %v225_v7  ;;  %961 = vmatprep.mubr.msk.f32.mxu1 %vm267_vm1, %v241_v9  ;;  %v237_v32 = vld [vmem:[%s1079_s6 + $0x70] sm:$0xff]  ;;  %v254_v33 = vld [vmem:[%s1079_s6 + $0xf8] sm:$0xff]  ;;  %v239_v35 = vld [vmem:[%s1079_s6 + $0x80] sm:$0xff] }
  0x18   : > { %962 = vmatmul.mubr.msk.f32.vlgmr.msra.gmra.mxu1 %vm267_vm1, %v242_v10  ;;  %v238_v34 = vld [vmem:[%s1079_s6 + $0x78] sm:$0xff]  ;;  %v240_v36 = vld [vmem:[%s1079_s6 + $0x88] sm:$0xff]  ;;  %982 = vmatprep.subr.mxu1 %v1021_v38  ;;  %v1163_v42 = vld [vmem:[%s1257_s2] ss:$0 sm:$0xff] }
  0x19   : > { %964 = vmatprep.mubr.msk.f32.mxu1 %vm267_vm1, %v243_v11  ;;  %983 = vmatpush3.msra.mxu1 %v700_v37 }
  0x1a   : > { %938 = vmatmul.mubr.msk.f32.gmra.mxu0 %vm267_vm1, %v226_v8  ;;  %984 = vmatprep.subr.mxu1 %v1021_v38 }
  0x1b   : > { %940 = vmatprep.mubr.msk.f32.mxu0 %vm267_vm1, %v227_v12  ;;  %985 = vmatpush3.msra.mxu1 %v699_v39 }
  0x1c   : > { %965 = vmatmul.mubr.msk.f32.gmra.mxu1 %vm267_vm1, %v244_v13  ;;  %986 = vmatprep.subr.mxu1 %v1021_v38 }
  0x1d   : > { %967 = vmatprep.mubr.msk.f32.mxu1 %vm267_vm1, %v245_v15  ;;  %987 = vmatpush3.msra.mxu1 %v698_v40 }
  0x1e   : > { %941 = vmatmul.mubr.msk.f32.gmra.mxu0 %vm267_vm1, %v228_v14  ;;  %988 = vmatprep.subr.mxu1 %v1021_v38 }
  0x1f   : > { %943 = vmatprep.mubr.msk.f32.mxu0 %vm267_vm1, %v229_v16  ;;  %989 = vmatpush3.msra.mxu1 %v697_v41 }
  0x20   : > { %968 = vmatmul.mubr.msk.f32.gmra.mxu1 %vm267_vm1, %v246_v17 }
  0x21   : > { %970 = vmatprep.mubr.msk.f32.mxu1 %vm267_vm1, %v247_v19 }
  0x22   : > { %944 = vmatmul.mubr.msk.f32.gmra.mxu0 %vm267_vm1, %v230_v18 }
  0x23   : > { %946 = vmatprep.mubr.msk.f32.mxu0 %vm267_vm1, %v231_v20 }
  0x24   : > { %971 = vmatmul.mubr.msk.f32.gmra.mxu1 %vm267_vm1, %v248_v21 }
  0x25   : > { %973 = vmatprep.mubr.msk.f32.mxu1 %vm267_vm1, %v249_v23 }
  0x26   : > { %947 = vmatmul.mubr.msk.f32.gmra.mxu0 %vm267_vm1, %v232_v22 }
  0x27   : > { %949 = vmatprep.mubr.msk.f32.mxu0 %vm267_vm1, %v233_v24 }
  0x28   : > { %974 = vmatmul.mubr.msk.f32.gmra.mxu1 %vm267_vm1, %v250_v25 }
  0x29   : > { %976 = vmatprep.mubr.msk.f32.mxu1 %vm267_vm1, %v251_v27 }
  0x2a   : > { %950 = vmatmul.mubr.msk.f32.gmra.mxu0 %vm267_vm1, %v234_v26 }
  0x2b   : > { %952 = vmatprep.mubr.msk.f32.mxu0 %vm267_vm1, %v235_v28 }
  0x2c   : > { %977 = vmatmul.mubr.msk.f32.gmra.mxu1 %vm267_vm1, %v252_v29 }
  0x2d   : > { %979 = vmatprep.mubr.msk.f32.mxu1 %vm267_vm1, %v253_v31 }
  0x2e   : > { %953 = vmatmul.mubr.msk.f32.gmra.mxu0 %vm267_vm1, %v236_v30 }
  0x2f   : > { %955 = vmatprep.mubr.msk.f32.mxu0 %vm267_vm1, %v237_v32 }
  0x30   : > { %980 = vmatmul.mubr.msk.f32.gmra.mxu1 %vm267_vm1, %v254_v33 }
  0x31   : > { %990 = vmatprep.mubr.msk.f32.mxu1 %vm1022_vm2, %v1021_v38 }
  0x32   : > { %956 = vmatmul.mubr.msk.f32.gmra.mxu0 %vm267_vm1, %v238_v34 }
  0x33   : > { %958 = vmatprep.mubr.msk.f32.mxu0 %vm267_vm1, %v239_v35 }
  0x36   : > { %959 = vmatmul.mubr.msk.f32.gmra.mxu0 %vm267_vm1, %v240_v36 }
  0xd6   : > { %v936_v43 = vpop.f32.mrf.mxu0 }
  0xd7   : > { %v440_v44 = vadd.f32 %v936_v43, %v1163_v42 }
  0xd8   : > { %v434_v45 = vpop.f32.mrf.mxu0  ;;  %v1167_v48 = vpop.f32.mrf.mxu1 }
  0xd9   : > { %v435_v46 = vadd.f32 %v1163_v42, %v434_v45  ;;  %v594_v49 = vmax.f32 %v440_v44, 0.0 }
  0xda   : > { %v939_v47 = vpop.f32.mrf.mxu0  ;;  %v1172_v56 = vpop.f32.mrf.mxu1 }
  0xdb   : > { %v593_v50 = vmax.f32 %v435_v46, 0.0  ;;  %v450_v51 = vadd.f32 %v939_v47, %v1163_v42  ;;  %v627_v57 = vsel %vm625_vm3, %v594_v49, 0.0 }
  0xdc   : > { %v444_v52 = vpop.f32.mrf.mxu0  ;;  %v1178_v3 = vpop.f32.mrf.mxu1 }
  0xdd   : > { %v626_v53 = vsel %vm625_vm3, %v593_v50, 0.0  ;;  %v445_v54 = vadd.f32 %v1163_v42, %v444_v52  ;;  %v596_v58 = vmax.f32 %v450_v51, 0.0 }
  0xde   : > { %v942_v55 = vpop.f32.mrf.mxu0  ;;  %v628_v61 = vadd.f32 %v627_v57, %v626_v53  ;;  %v1184_v14 = vpop.f32.mrf.mxu1 }
  0xdf   : > { %v595_v59 = vmax.f32 %v445_v54, 0.0  ;;  %v460_v60 = vadd.f32 %v942_v55, %v1163_v42  ;;  %v631_v4 = vsel %vm625_vm3, %v596_v58, 0.0 }
  0xe0   : > { %v454_v62 = vpop.f32.mrf.mxu0  ;;  %v1190_v25 = vpop.f32.mrf.mxu1 }
  0xe1   : > { %v629_v63 = vsel %vm625_vm3, %v595_v59, 0.0  ;;  %v455_v0 = vadd.f32 %v1163_v42, %v454_v62  ;;  %v598_v5 = vmax.f32 %v460_v60, 0.0 }
  0xe2   : > { %v630_v1 = vadd.f32 %v629_v63, %v628_v61  ;;  %v945_v2 = vpop.f32.mrf.mxu0  ;;  %v544_v36 = vpop.f32.mrf.mxu1 }
  0xe3   : > { %v597_v6 = vmax.f32 %v455_v0, 0.0  ;;  %v470_v7 = vadd.f32 %v945_v2, %v1163_v42  ;;  %v635_v15 = vsel %vm625_vm3, %v598_v5, 0.0 }
  0xe4   : > { %v632_v8 = vadd.f32 %v631_v4, %v630_v1  ;;  %v464_v9 = vpop.f32.mrf.mxu0  ;;  %v972_v49 = vpop.f32.mrf.mxu1 }
  0xe5   : > { %v633_v10 = vsel %vm625_vm3, %v597_v6, 0.0  ;;  %v465_v11 = vadd.f32 %v1163_v42, %v464_v9  ;;  %v600_v16 = vmax.f32 %v470_v7, 0.0  ;;  %v525_v7 = vadd.f32 %v1163_v42, %v1172_v56 }
  0xe6   : > { %v634_v12 = vadd.f32 %v633_v10, %v632_v8  ;;  %v948_v13 = vpop.f32.mrf.mxu0  ;;  %v554_v61 = vpop.f32.mrf.mxu1 }
  0xe7   : > { %v599_v17 = vmax.f32 %v465_v11, 0.0  ;;  %v480_v18 = vadd.f32 %v948_v13, %v1163_v42  ;;  %v639_v26 = vsel %vm625_vm3, %v600_v16, 0.0  ;;  %v530_v13 = vadd.f32 %v1167_v48, %v1163_v42 }
  0xe8   : > { %v636_v19 = vadd.f32 %v635_v15, %v634_v12  ;;  %v474_v20 = vpop.f32.mrf.mxu0  ;;  %v975_v9 = vpop.f32.mrf.mxu1  ;;  %v545_v48 = vadd.f32 %v1163_v42, %v544_v36  ;;  %v560_v36 = vadd.f32 %v972_v49, %v1163_v42 }
  0xe9   : > { %v637_v21 = vsel %vm625_vm3, %v599_v17, 0.0  ;;  %v475_v22 = vadd.f32 %v1163_v42, %v474_v20  ;;  %v602_v27 = vmax.f32 %v480_v18, 0.0  ;;  %v611_v17 = vmax.f32 %v525_v7, 0.0 }
  0xea   : > { %v638_v23 = vadd.f32 %v637_v21, %v636_v19  ;;  %v951_v24 = vpop.f32.mrf.mxu0  ;;  %v535_v18 = vadd.f32 %v1163_v42, %v1184_v14  ;;  %v564_v20 = vpop.f32.mrf.mxu1  ;;  %v612_v21 = vmax.f32 %v530_v13, 0.0  ;;  %v550_v14 = vadd.f32 %v1190_v25, %v1163_v42 }
  0xeb   : > { %v601_v28 = vmax.f32 %v475_v22, 0.0  ;;  %v490_v29 = vadd.f32 %v951_v24, %v1163_v42  ;;  %v643_v37 = vsel %vm625_vm3, %v602_v27, 0.0  ;;  %v540_v22 = vadd.f32 %v1178_v3, %v1163_v42 }
  0xec   : > { %v640_v30 = vadd.f32 %v639_v26, %v638_v23  ;;  %v484_v31 = vpop.f32.mrf.mxu0  ;;  %v661_v24 = vsel %vm625_vm3, %v611_v17, 0.0  ;;  %v613_v26 = vmax.f32 %v535_v18, 0.0  ;;  %v555_v3 = vadd.f32 %v1163_v42, %v554_v61 }
  0xed   : > { %v641_v32 = vsel %vm625_vm3, %v601_v28, 0.0  ;;  %v485_v33 = vadd.f32 %v1163_v42, %v484_v31  ;;  %v604_v38 = vmax.f32 %v490_v29, 0.0  ;;  %v978_v28 = vpop.f32.mrf.mxu1  ;;  %v663_v29 = vsel %vm625_vm3, %v612_v21, 0.0  ;;  %v877_v21 = vld [vmem:[%s1259_s4] ss:$0 sm:$0xff] }
  0xee   : > { %v642_v34 = vadd.f32 %v641_v32, %v640_v30  ;;  %v954_v35 = vpop.f32.mrf.mxu0  ;;  %v614_v30 = vmax.f32 %v540_v22, 0.0  ;;  %v665_v32 = vsel %vm625_vm3, %v613_v26, 0.0 }
  0xef   : > { %v603_v39 = vmax.f32 %v485_v33, 0.0  ;;  %v500_v40 = vadd.f32 %v954_v35, %v1163_v42  ;;  %v647_v50 = vsel %vm625_vm3, %v604_v38, 0.0  ;;  %v615_v33 = vmax.f32 %v545_v48, 0.0  ;;  %v574_v35 = vpop.f32.mrf.mxu1 }
  0xf0   : > { %v644_v41 = vadd.f32 %v643_v37, %v642_v34  ;;  %v494_v43 = vpop.f32.mrf.mxu0  ;;  %v667_v37 = vsel %vm625_vm3, %v614_v30, 0.0  ;;  %v616_v38 = vmax.f32 %v550_v14, 0.0 }
  0xf1   : > { %v645_v44 = vsel %vm625_vm3, %v603_v39, 0.0  ;;  %v495_v45 = vadd.f32 %v1163_v42, %v494_v43  ;;  %v606_v51 = vmax.f32 %v500_v40, 0.0  ;;  %v669_v40 = vsel %vm625_vm3, %v615_v33, 0.0 }
  0xf2   : > { %v646_v46 = vadd.f32 %v645_v44, %v644_v41  ;;  %v957_v47 = vpop.f32.mrf.mxu0  ;;  %v617_v41 = vmax.f32 %v555_v3, 0.0  ;;  %v565_v43 = vadd.f32 %v1163_v42, %v564_v20  ;;  %v981_v44 = vpop.f32.mrf.mxu1 }
  0xf3   : > { %v605_v52 = vmax.f32 %v495_v45, 0.0  ;;  %v510_v53 = vadd.f32 %v957_v47, %v1163_v42  ;;  %v651_v62 = vsel %vm625_vm3, %v606_v51, 0.0  ;;  %v671_v45 = vsel %vm625_vm3, %v616_v38, 0.0 }
  0xf4   : > { %v648_v54 = vadd.f32 %v647_v50, %v646_v46  ;;  %v504_v55 = vpop.f32.mrf.mxu0  ;;  %v618_v46 = vmax.f32 %v560_v36, 0.0  ;;  %v570_v47 = vadd.f32 %v975_v9, %v1163_v42  ;;  %v673_v51 = vsel %vm625_vm3, %v617_v41, 0.0 }
  0xf5   : > { %v649_v57 = vsel %vm625_vm3, %v605_v52, 0.0  ;;  %v505_v58 = vadd.f32 %v1163_v42, %v504_v55  ;;  %v608_v63 = vmax.f32 %v510_v53, 0.0  ;;  %v619_v52 = vmax.f32 %v565_v43, 0.0 }
  0xf6   : > { %v650_v59 = vadd.f32 %v649_v57, %v648_v54  ;;  %v960_v60 = vpop.f32.mrf.mxu0  ;;  %v575_v53 = vadd.f32 %v1163_v42, %v574_v35  ;;  %v584_v54 = vpop.f32.mrf.mxu1  ;;  %v675_v55 = vsel %vm625_vm3, %v618_v46, 0.0  ;;  %v620_v57 = vmax.f32 %v570_v47, 0.0 }
  0xf7   : > { %v607_v0 = vmax.f32 %v505_v58, 0.0  ;;  %v520_v1 = vadd.f32 %v960_v60, %v1163_v42  ;;  %v655_v10 = vsel %vm625_vm3, %v608_v63, 0.0  ;;  %v580_v58 = vadd.f32 %v978_v28, %v1163_v42 }
  0xf8   : > { %v652_v2 = vadd.f32 %v651_v62, %v650_v59  ;;  %v514_v4 = vpop.f32.mrf.mxu0  ;;  %v677_v60 = vsel %vm625_vm3, %v619_v52, 0.0  ;;  %v621_v61 = vmax.f32 %v575_v53, 0.0  ;;  %v585_v62 = vadd.f32 %v1163_v42, %v584_v54 }
  0xf9   : > { %v653_v5 = vsel %vm625_vm3, %v607_v0, 0.0  ;;  %v515_v6 = vadd.f32 %v1163_v42, %v514_v4  ;;  %v610_v11 = vmax.f32 %v520_v1, 0.0  ;;  %v679_v0 = vsel %vm625_vm3, %v620_v57, 0.0 }
  0xfa   : > { %v654_v8 = vadd.f32 %v653_v5, %v652_v2  ;;  %v622_v1 = vmax.f32 %v580_v58, 0.0  ;;  %v590_v2 = vadd.f32 %v981_v44, %v1163_v42  ;;  %v681_v5 = vsel %vm625_vm3, %v621_v61, 0.0 }
  0xfb   : > { %v609_v12 = vmax.f32 %v515_v6, 0.0  ;;  %v659_v56 = vsel %vm625_vm3, %v610_v11, 0.0  ;;  %v623_v6 = vmax.f32 %v585_v62, 0.0 }
  0xfc   : > { %v656_v15 = vadd.f32 %v655_v10, %v654_v8  ;;  %v683_v8 = vsel %vm625_vm3, %v622_v1, 0.0  ;;  %v624_v9 = vmax.f32 %v590_v2, 0.0 }
  0xfd   : > { %v657_v16 = vsel %vm625_vm3, %v609_v12, 0.0  ;;  %v685_v11 = vsel %vm625_vm3, %v623_v6, 0.0 }
  0xfe   : > { %v658_v19 = vadd.f32 %v657_v16, %v656_v15  ;;  %v687_v13 = vsel %vm625_vm3, %v624_v9, 0.0 }
 0x100   : > { %v660_v23 = vadd.f32 %v659_v56, %v658_v19 }
 0x102   : > { %v662_v27 = vadd.f32 %v661_v24, %v660_v23 }
 0x104   : > { %v664_v31 = vadd.f32 %v663_v29, %v662_v27 }
 0x106   : > { %v666_v34 = vadd.f32 %v665_v32, %v664_v31 }
 0x108   : > { %v668_v39 = vadd.f32 %v667_v37, %v666_v34 }
 0x10a   : > { %v670_v25 = vadd.f32 %v669_v40, %v668_v39 }
 0x10c   : > { %v672_v50 = vadd.f32 %v671_v45, %v670_v25 }
 0x10e   : > { %v674_v49 = vadd.f32 %v673_v51, %v672_v50 }
 0x110   : > { %v676_v59 = vadd.f32 %v675_v55, %v674_v49 }
 0x112   : > { %v678_v63 = vadd.f32 %v677_v60, %v676_v59 }
 0x114   : > { %v680_v4 = vadd.f32 %v679_v0, %v678_v63 }
 0x116   : > { %v682_v7 = vadd.f32 %v681_v5, %v680_v4 }
 0x118   : > { %v684_v10 = vadd.f32 %v683_v8, %v682_v7 }
 0x11a   : > { %v686_v12 = vadd.f32 %v685_v11, %v684_v10 }
 0x11c   : > { %v688_v15 = vadd.f32 %v687_v13, %v686_v12 }
 0x11e   : > { %v689_v16 = vrot.slane %v688_v15, 4 }
 0x120   : > { %v690_v17 = vadd.f32 %v689_v16, %v688_v15 }
 0x122   : > { %v691_v18 = vrot.slane %v690_v17, 2 }
 0x124   : > { %v692_v42 = vadd.f32 %v691_v18, %v690_v17 }
 0x126   : > { %v693_v19 = vrot.slane %v692_v42, 1 }
 0x128   : > { %v694_v20 = vadd.f32 %v693_v19, %v692_v42 }
 0x12a   : > { %v696_v56 = vmul.f32 0.00390625, %v694_v20 }
 0x12c   : > { %991 = vmatmul.mubr.msk.f32.vlgmr.msra.gmra.mxu1 %vm625_vm3, %v696_v56 }
 0x1ec   : > { %v777_v22 = vpop.f32.mrf.mxu1 }
 0x1ed   : > { %v778_v23 = vadd.f32 %v877_v21, %v777_v22 }
 0x1ee   : > { %v992_v24 = vpop.f32.mrf.mxu1 }
 0x1ef   : > { %781 = vst [vmem:[%s222_s26] sm:$0xff] %v778_v23 }
 0x1f0 PF: > { %s15_s18 = sadd.s32 1, %s1019_s18  }
 0x1f1   : > { %p12_p4 = scmp.ge.s32.totalorder %s15_s18, 4  }
 0x1f3   :  { %14 = sbr.rel (!%p12_p4) target bundleno = 1 (0x1), region = 70 }

</bundles_post_ra>
